<compile_context>
chip_gen: v7x
topology: tpu7x:2x2x1
jax: 0.10.0
libtpu: 0.0.40
codegen_flags: <defaults>
</compile_context>

<pallas_src>
import jax
import jax.numpy as jnp
from jax.experimental import pallas as pl
from jax.experimental.pallas import tpu as pltpu

_HEADS_PAD = 32  # offset(3) + cls(24) zero-padded to 32 sublanes


def _voting_kernel(x_ref,
                   w1_ref, b1_ref,
                   w2_ref, b2_ref,
                   w3_ref, b3_ref,
                   vfeat_ref, heads_ref):
    """One (batch, N-tile) block: 3 pointwise convs as channel-major matmuls."""
    C = vfeat_ref.shape[0]

    xb = x_ref[...]                                   # (C, tn) bf16 (streamed)

    # conv1 (+ folded BN) + relu
    h = jnp.dot(w1_ref[...], xb, preferred_element_type=jnp.float32)
    h = jnp.maximum(h + b1_ref[...], 0.0)

    # conv2 (+ folded BN) + relu
    h = jnp.dot(w2_ref[...], h.astype(jnp.bfloat16),
                preferred_element_type=jnp.float32)
    h = jnp.maximum(h + b2_ref[...], 0.0)

    # conv3 (+ bias); rows pre-ordered as [resid(C), offset(3), cls(24), pad(5)]
    h = jnp.dot(w3_ref[...], h.astype(jnp.bfloat16),
                preferred_element_type=jnp.float32)
    h = h + b3_ref[...]                               # (C + 32, tn) f32

    vfeat_ref[...] = xb.astype(jnp.float32) + h[:C, :]   # vote_features (channel-major)
    heads_ref[...] = h[C:, :]                             # packed [offset(3), cls(24), pad(5)]


def _pick_tile_n(N, B, min_steps=4):
    """Largest tile in {1024..128} dividing N that still gives >= min_steps grid steps."""
    divisors = [t for t in (1024, 512, 256, 128) if N % t == 0]
    if not divisors:
        return N  # block = full row; correct, masked lane stores if N % 128 != 0
    for t in divisors:
        if B * (N // t) >= min_steps:
            return t
    return divisors[-1]


def voting_module_forward(seed_xyz, seed_features, params, *, tile_n=None):
    """seed_xyz: (B, N, 3), seed_features: (B, C, N) -> PyTorch-equivalent outputs."""
    B, N, _ = seed_xyz.shape
    C = seed_features.shape[1]
    out_c = C + _HEADS_PAD
    assert C % 8 == 0, "seed_feature_dim must be a multiple of 8"

    if tile_n is None:
        tile_n = _pick_tile_n(N, B)
    assert N % tile_n == 0

    # bf16 streaming of seed_features (no-op if caller already supplies bf16).
    x_bf16 = seed_features.astype(jnp.bfloat16)
    seed_xyz = seed_xyz.astype(jnp.float32)
    w1, b1, w2, b2, w3, b3 = params

    grid = (B, N // tile_n)

    x_spec = pl.BlockSpec((pl.Squeezed(), C, tile_n), lambda b, j: (b, 0, j))
    vfeat_spec = pl.BlockSpec((pl.Squeezed(), C, tile_n), lambda b, j: (b, 0, j))
    heads_spec = pl.BlockSpec((pl.Squeezed(), _HEADS_PAD, tile_n),
                              lambda b, j: (b, 0, j))
    const = lambda shape: pl.BlockSpec(shape, lambda b, j: (0, 0))

    out_shapes = (
        jax.ShapeDtypeStruct((B, C, N), jnp.float32),          # vote_features
        jax.ShapeDtypeStruct((B, _HEADS_PAD, N), jnp.float32),  # packed heads
    )

    vfeat, heads = pl.pallas_call(
        _voting_kernel,
        out_shape=out_shapes,
        grid_spec=pltpu.PrefetchScalarGridSpec(
            num_scalar_prefetch=0,
            grid=grid,
            in_specs=[
                x_spec,              # seed_features tile (bf16)
                const((C, C)),       # w1 (bf16, BN scale folded in)
                const((C, 1)),       # b1 (f32, BN shift folded in)
                const((C, C)),       # w2
                const((C, 1)),       # b2
                const((out_c, C)),   # w3 (rows: resid, offset, cls, zero-pad)
                const((out_c, 1)),   # b3
            ],
            out_specs=[vfeat_spec, heads_spec],
        ),
        compiler_params=pltpu.CompilerParams(
            dimension_semantics=("parallel", "parallel"),
            vmem_limit_bytes=32 * 1024 * 1024),
    )(x_bf16, w1, b1, w2, b2, w3, b3)

    # Single transpose of the small heads slab, then slice (XLA epilogue).
    ht = jnp.transpose(heads, (0, 2, 1))              # (B, N, 32)
    offset = ht[:, :, 0:3]                            # (B, N, 3)
    classify_score = ht[:, :, 3:27]                   # (B, N, 24)
    vote_xyz = seed_xyz + offset
    return vote_xyz, vfeat, offset, classify_score


def make_params(key, seed_feature_dim):
    """Deterministic synthetic parameters; BN folded into weights/shifts offline."""
    C = seed_feature_dim
    out_c_torch = 3 + C + 24          # PyTorch conv3 out channels
    out_c = C + _HEADS_PAD            # kernel-side (zero-padded) out channels
    eps = 1e-5
    ks = jax.random.split(key, 10)

    # Conv1d weights in PyTorch layout (C_out, C_in) (kernel_size=1 squeezed).
    w1 = jax.random.normal(ks[0], (C, C), jnp.float32) * 0.1
    b1 = jax.random.normal(ks[1], (C,), jnp.float32) * 0.05
    w2 = jax.random.normal(ks[2], (C, C), jnp.float32) * 0.1
    b2 = jax.random.normal(ks[3], (C,), jnp.float32) * 0.05
    w3 = jax.random.normal(ks[4], (out_c_torch, C), jnp.float32) * 0.1
    b3 = jax.random.normal(ks[5], (out_c_torch,), jnp.float32) * 0.05

    # BatchNorm (inference) parameters.
    g1 = 1.0 + 0.1 * jax.random.normal(ks[6], (C,), jnp.float32)
    be1 = 0.05 * jax.random.normal(ks[7], (C,), jnp.float32)
    m1 = 0.1 * jax.random.normal(ks[8], (C,), jnp.float32)
    v1 = 1.0 + 0.1 * jnp.abs(jax.random.normal(ks[9], (C,), jnp.float32))
    g2, be2, m2, v2 = g1[::-1], be1[::-1], m1[::-1], v1[::-1]

    # Fold: bn(conv(x)) = (scale * W) @ x + ((b - mean) * scale + beta)
    s1 = g1 / jnp.sqrt(v1 + eps)
    s2 = g2 / jnp.sqrt(v2 + eps)
    w1f = (s1[:, None] * w1).astype(jnp.bfloat16)
    w2f = (s2[:, None] * w2).astype(jnp.bfloat16)
    sh1 = ((b1 - m1) * s1 + be1).reshape(C, 1).astype(jnp.float32)
    sh2 = ((b2 - m2) * s2 + be2).reshape(C, 1).astype(jnp.float32)

    # Reorder conv3 rows [offset(3), cls(24), resid(C)] -> [resid(C), offset(3), cls(24)]
    # and zero-pad 5 rows so the heads slab is 32 sublanes (full (8,128) stores).
    perm = jnp.concatenate([jnp.arange(27, out_c_torch), jnp.arange(0, 27)])
    w3r = w3[perm]
    b3r = b3[perm]
    w3p = jnp.concatenate(
        [w3r, jnp.zeros((_HEADS_PAD - 27, C), jnp.float32)], axis=0
    ).astype(jnp.bfloat16)                                        # (C+32, C)
    b3p = jnp.concatenate(
        [b3r, jnp.zeros((_HEADS_PAD - 27,), jnp.float32)], axis=0
    ).reshape(out_c, 1).astype(jnp.float32)                       # (C+32, 1)

    return (w1f, sh1, w2f, sh2, w3p, b3p)


def _reference_forward(seed_xyz, seed_features, params):
    """Pure-JAX reference mirroring the PyTorch forward with the same folded params."""
    w1, b1, w2, b2, w3, b3 = params
    C = seed_features.shape[1]
    xb = seed_features.astype(jnp.bfloat16)

    h = jnp.einsum("oc,bcn->bon", w1, xb, preferred_element_type=jnp.float32)
    h = jnp.maximum(h + b1[None], 0.0)
    h = jnp.einsum("oc,bcn->bon", w2, h.astype(jnp.bfloat16),
                   preferred_element_type=jnp.float32)
    h = jnp.maximum(h + b2[None], 0.0)
    h = jnp.einsum("oc,bcn->bon", w3, h.astype(jnp.bfloat16),
                   preferred_element_type=jnp.float32) + b3[None]

    resid = h[:, :C, :]
    offset = jnp.transpose(h[:, C:C + 3, :], (0, 2, 1))
    classify_score = jnp.transpose(h[:, C + 3:C + 27, :], (0, 2, 1))
    vote_xyz = seed_xyz.astype(jnp.float32) + offset
    vote_features = xb.astype(jnp.float32) + resid
    return vote_xyz, vote_features, offset, classify_score


if __name__ == "__main__":
    B, C, N = 2, 32, 256          # batch, seed_feature_dim, num_seed (vote_factor = 1)
    key = jax.random.PRNGKey(0)
    k_xyz, k_feat, k_par = jax.random.split(key, 3)

    seed_xyz = jax.random.normal(k_xyz, (B, N, 3), jnp.float32)
    seed_features = jax.random.normal(k_feat, (B, C, N), jnp.float32)
    params = make_params(k_par, C)

    fwd = jax.jit(voting_module_forward)
    outs = jax.block_until_ready(fwd(seed_xyz, seed_features, params))

    refs = _reference_forward(seed_xyz, seed_features, params)
    expected_shapes = ((B, N, 3), (B, C, N), (B, N, 3), (B, N, 24))
    names = ("vote_xyz", "vote_features", "offset", "classify_score")
    for name, o, r, es in zip(names, outs, refs, expected_shapes):
        assert o.shape == es, (name, o.shape, es)
        assert o.shape == r.shape and o.dtype == r.dtype, (name, o.shape, o.dtype)
        assert jnp.allclose(o, r, atol=1e-2, rtol=1e-2), f"mismatch vs reference: {name}"

    print("KERNEL_OK")
</pallas_src>

<mosaic_0001>
module attributes {stable_mosaic.version = 11 : i64} {
  func.func @_voting_kernel(%arg0: i32, %arg1: i32, %arg2: memref<1x32x128xbf16, #tpu.memory_space<vmem>>, %arg3: memref<32x32xbf16, #tpu.memory_space<vmem>>, %arg4: memref<32x1xf32, #tpu.memory_space<vmem>>, %arg5: memref<32x32xbf16, #tpu.memory_space<vmem>>, %arg6: memref<32x1xf32, #tpu.memory_space<vmem>>, %arg7: memref<64x32xbf16, #tpu.memory_space<vmem>>, %arg8: memref<64x1xf32, #tpu.memory_space<vmem>>, %arg9: memref<1x32x128xf32, #tpu.memory_space<vmem>>, %arg10: memref<1x32x128xf32, #tpu.memory_space<vmem>>) attributes {dimension_semantics = [#tpu.dimension_semantics<parallel>, #tpu.dimension_semantics<parallel>], iteration_bounds = array<i64: 2, 2>, scalar_prefetch = 0 : i64, scratch_operands = 0 : i64, tpu.core_type = #tpu.core_type<tc>, window_params = [{transform_indices = @transform_0, window_bounds = array<i64: 1, 32, 128>}, {pipeline_mode = #tpu.pipeline_mode<synchronous>, transform_indices = @transform_1, window_bounds = array<i64: 32, 32>}, {pipeline_mode = #tpu.pipeline_mode<synchronous>, transform_indices = @transform_2, window_bounds = array<i64: 32, 1>}, {pipeline_mode = #tpu.pipeline_mode<synchronous>, transform_indices = @transform_3, window_bounds = array<i64: 32, 32>}, {pipeline_mode = #tpu.pipeline_mode<synchronous>, transform_indices = @transform_4, window_bounds = array<i64: 32, 1>}, {pipeline_mode = #tpu.pipeline_mode<synchronous>, transform_indices = @transform_5, window_bounds = array<i64: 64, 32>}, {pipeline_mode = #tpu.pipeline_mode<synchronous>, transform_indices = @transform_6, window_bounds = array<i64: 64, 1>}, {transform_indices = @transform_7, window_bounds = array<i64: 1, 32, 128>}, {transform_indices = @transform_8, window_bounds = array<i64: 1, 32, 128>}]} {
    %c0 = arith.constant 0 : index
    %c0_0 = arith.constant 0 : index
    %c0_1 = arith.constant 0 : index
    %0 = vector.load %arg2[%c0, %c0_0, %c0_1] : memref<1x32x128xbf16, #tpu.memory_space<vmem>>, vector<1x32x128xbf16>
    %1 = vector.shape_cast %0 : vector<1x32x128xbf16> to vector<32x128xbf16>
    %c0_2 = arith.constant 0 : index
    %c0_3 = arith.constant 0 : index
    %2 = vector.load %arg3[%c0_2, %c0_3] : memref<32x32xbf16, #tpu.memory_space<vmem>>, vector<32x32xbf16>
    %cst = arith.constant dense<0.000000e+00> : vector<32x128xf32>
    %3 = tpu.matmul %2, %1, %cst {dimension_numbers = #tpu.dot_dimension_numbers<[1], [0], [0], [1], [0, 0, 1, 1], [], []>} : vector<32x32xbf16>, vector<32x128xbf16>, vector<32x128xf32> -> vector<32x128xf32>
    %c0_4 = arith.constant 0 : index
    %c0_5 = arith.constant 0 : index
    %4 = vector.load %arg4[%c0_4, %c0_5] : memref<32x1xf32, #tpu.memory_space<vmem>>, vector<32x1xf32>
    %5 = vector.broadcast %4 : vector<32x1xf32> to vector<32x128xf32>
    %6 = arith.addf %3, %5 : vector<32x128xf32>
    %cst_6 = arith.constant 0.000000e+00 : f32
    %7 = vector.broadcast %cst_6 : f32 to vector<32x128xf32>
    %8 = arith.maximumf %6, %7 : vector<32x128xf32>
    %c0_7 = arith.constant 0 : index
    %c0_8 = arith.constant 0 : index
    %9 = vector.load %arg5[%c0_7, %c0_8] : memref<32x32xbf16, #tpu.memory_space<vmem>>, vector<32x32xbf16>
    %10 = arith.truncf %8 : vector<32x128xf32> to vector<32x128xbf16>
    %cst_9 = arith.constant dense<0.000000e+00> : vector<32x128xf32>
    %11 = tpu.matmul %9, %10, %cst_9 {dimension_numbers = #tpu.dot_dimension_numbers<[1], [0], [0], [1], [0, 0, 1, 1], [], []>} : vector<32x32xbf16>, vector<32x128xbf16>, vector<32x128xf32> -> vector<32x128xf32>
    %c0_10 = arith.constant 0 : index
    %c0_11 = arith.constant 0 : index
    %12 = vector.load %arg6[%c0_10, %c0_11] : memref<32x1xf32, #tpu.memory_space<vmem>>, vector<32x1xf32>
    %13 = vector.broadcast %12 : vector<32x1xf32> to vector<32x128xf32>
    %14 = arith.addf %11, %13 : vector<32x128xf32>
    %cst_12 = arith.constant 0.000000e+00 : f32
    %15 = vector.broadcast %cst_12 : f32 to vector<32x128xf32>
    %16 = arith.maximumf %14, %15 : vector<32x128xf32>
    %c0_13 = arith.constant 0 : index
    %c0_14 = arith.constant 0 : index
    %17 = vector.load %arg7[%c0_13, %c0_14] : memref<64x32xbf16, #tpu.memory_space<vmem>>, vector<64x32xbf16>
    %18 = arith.truncf %16 : vector<32x128xf32> to vector<32x128xbf16>
    %cst_15 = arith.constant dense<0.000000e+00> : vector<64x128xf32>
    %19 = tpu.matmul %17, %18, %cst_15 {dimension_numbers = #tpu.dot_dimension_numbers<[1], [0], [0], [1], [0, 0, 1, 1], [], []>} : vector<64x32xbf16>, vector<32x128xbf16>, vector<64x128xf32> -> vector<64x128xf32>
    %c0_16 = arith.constant 0 : index
    %c0_17 = arith.constant 0 : index
    %20 = vector.load %arg8[%c0_16, %c0_17] : memref<64x1xf32, #tpu.memory_space<vmem>>, vector<64x1xf32>
    %21 = vector.broadcast %20 : vector<64x1xf32> to vector<64x128xf32>
    %22 = arith.addf %19, %21 : vector<64x128xf32>
    %23 = arith.extf %1 : vector<32x128xbf16> to vector<32x128xf32>
    %24 = vector.extract_strided_slice %22 {offsets = [0, 0], sizes = [32, 128], strides = [1, 1]} : vector<64x128xf32> to vector<32x128xf32>
    %25 = arith.addf %23, %24 : vector<32x128xf32>
    %c0_18 = arith.constant 0 : index
    %c0_19 = arith.constant 0 : index
    %c0_20 = arith.constant 0 : index
    %26 = vector.load %arg9[%c0_18, %c0_19, %c0_20] : memref<1x32x128xf32, #tpu.memory_space<vmem>>, vector<1x32x128xf32>
    %27 = vector.shape_cast %26 : vector<1x32x128xf32> to vector<32x128xf32>
    %28 = vector.shape_cast %25 : vector<32x128xf32> to vector<1x32x128xf32>
    tpu.vector_store %arg9[%c0_18, %c0_19, %c0_20], %28 {strides = array<i32>} : memref<1x32x128xf32, #tpu.memory_space<vmem>>, vector<1x32x128xf32>,
    %29 = vector.extract_strided_slice %22 {offsets = [32, 0], sizes = [32, 128], strides = [1, 1]} : vector<64x128xf32> to vector<32x128xf32>
    %c0_21 = arith.constant 0 : index
    %c0_22 = arith.constant 0 : index
    %c0_23 = arith.constant 0 : index
    %30 = vector.load %arg10[%c0_21, %c0_22, %c0_23] : memref<1x32x128xf32, #tpu.memory_space<vmem>>, vector<1x32x128xf32>
    %31 = vector.shape_cast %30 : vector<1x32x128xf32> to vector<32x128xf32>
    %32 = vector.shape_cast %29 : vector<32x128xf32> to vector<1x32x128xf32>
    tpu.vector_store %arg10[%c0_21, %c0_22, %c0_23], %32 {strides = array<i32>} : memref<1x32x128xf32, #tpu.memory_space<vmem>>, vector<1x32x128xf32>,
    return
  }
  func.func @transform_0(%arg0: i32, %arg1: i32) -> (i32, i32, i32) {
    %c0_i32 = arith.constant 0 : i32
    %c0_i32_0 = arith.constant 0 : i32
    return %arg0, %c0_i32, %arg1 : i32, i32, i32
  }
  func.func @transform_1(%arg0: i32, %arg1: i32) -> (i32, i32) {
    %c0_i32 = arith.constant 0 : i32
    %c0_i32_0 = arith.constant 0 : i32
    %c0_i32_1 = arith.constant 0 : i32
    return %c0_i32, %c0_i32_0 : i32, i32
  }
  func.func @transform_2(%arg0: i32, %arg1: i32) -> (i32, i32) {
    %c0_i32 = arith.constant 0 : i32
    %c0_i32_0 = arith.constant 0 : i32
    %c0_i32_1 = arith.constant 0 : i32
    return %c0_i32, %c0_i32_0 : i32, i32
  }
  func.func @transform_3(%arg0: i32, %arg1: i32) -> (i32, i32) {
    %c0_i32 = arith.constant 0 : i32
    %c0_i32_0 = arith.constant 0 : i32
    %c0_i32_1 = arith.constant 0 : i32
    return %c0_i32, %c0_i32_0 : i32, i32
  }
  func.func @transform_4(%arg0: i32, %arg1: i32) -> (i32, i32) {
    %c0_i32 = arith.constant 0 : i32
    %c0_i32_0 = arith.constant 0 : i32
    %c0_i32_1 = arith.constant 0 : i32
    return %c0_i32, %c0_i32_0 : i32, i32
  }
  func.func @transform_5(%arg0: i32, %arg1: i32) -> (i32, i32) {
    %c0_i32 = arith.constant 0 : i32
    %c0_i32_0 = arith.constant 0 : i32
    %c0_i32_1 = arith.constant 0 : i32
    return %c0_i32, %c0_i32_0 : i32, i32
  }
  func.func @transform_6(%arg0: i32, %arg1: i32) -> (i32, i32) {
    %c0_i32 = arith.constant 0 : i32
    %c0_i32_0 = arith.constant 0 : i32
    %c0_i32_1 = arith.constant 0 : i32
    return %c0_i32, %c0_i32_0 : i32, i32
  }
  func.func @transform_7(%arg0: i32, %arg1: i32) -> (i32, i32, i32) {
    %c0_i32 = arith.constant 0 : i32
    %c0_i32_0 = arith.constant 0 : i32
    return %arg0, %c0_i32, %arg1 : i32, i32, i32
  }
  func.func @transform_8(%arg0: i32, %arg1: i32) -> (i32, i32, i32) {
    %c0_i32 = arith.constant 0 : i32
    %c0_i32_0 = arith.constant 0 : i32
    return %arg0, %c0_i32, %arg1 : i32, i32, i32
  }
}

</mosaic_0001>

<bundles_post_ra>
// kernel: voting_module_forward.1
= control target key start
LH: loop header
LB: loop body
LE: loop exit
PB: predicated region body
PF: predicated region fallthrough
CT: control target
= control target key end

     0   :  { %14 = vsyncpa [#allocation4], 0  ;;  %s1522_s0 = inlined_call_operand.vmem [shape: bf16[2,32,256], index: 0, kind: input, shape index: {}]   ;;  %s1523_s1 = inlined_call_operand.vmem [shape: bf16[32,32], index: 1, kind: input, shape index: {}]   ;;  %s1524_s2 = inlined_call_operand.vmem [shape: f32[32,1], index: 2, kind: input, shape index: {}]   ;;  %s1525_s3 = inlined_call_operand.vmem [shape: bf16[32,32], index: 3, kind: input, shape index: {}]   ;;  %s1526_s4 = inlined_call_operand.vmem [shape: f32[32,1], index: 4, kind: input, shape index: {}]   ;;  %s1527_s5 = inlined_call_operand.vmem [shape: bf16[64,32], index: 5, kind: input, shape index: {}]   ;;  %s1528_s6 = inlined_call_operand.vmem [shape: f32[64,1], index: 6, kind: input, shape index: {}]   ;;  %s1529_s7 = inlined_call_operand.hbm [shape: f32[2,32,256], index: 7, kind: output, shape index: {0}]   ;;  %s1530_s8 = inlined_call_operand.vmem [shape: f32[2,32,256], index: 8, kind: output, shape index: {1}]  }
   0x1   :  { %16 = vsyncpa [#allocation4 + $0x1], 0  ;;  %s1266_s27 = smov 0   ;;  %s1268_s28 = smov 0  }
   0x2   :  { %s1270_s29 = smov 0   ;;  %s1272_s30 = smov 0  }
   0x3   :  { %s1274_s9 = smov 0   ;;  %s1276_s10 = smov 0  }
   0x4   :  { %s1278_s11 = smov 0   ;;  %s1280_s12 = smov 0  }
   0x5 LB: > { %s952_s13 = sadd.s32 4294967295, %s1214_s12   ;;  %s953_s14 = sadd.s32 4294967294, %s1214_s12   ;;  %s1214_s12 = sphi %s1280_s12, %s22_s12   ;;  %s1210_s11 = sphi %s1278_s11, %s1549_s11   ;;  %s1206_s10 = sphi %s1276_s10, %s1548_s10   ;;  %s1202_s9 = sphi %s1274_s9, %s1547_s9   ;;  %s1198_s30 = sphi %s1272_s30, %s1546_s30   ;;  %s1194_s29 = sphi %s1270_s29, %s1545_s29   ;;  %s1190_s28 = sphi %s1268_s28, %s1544_s28   ;;  %s1186_s27 = sphi %s1266_s27, %s1543_s27  }
   0x6   : > { %s31_s15 = sadd.s32 1, %s1206_s10  ;;  %s34_s16 = sadd.s32 1, %s1210_s11 }
   0x7   : > { %p32_p0 = scmp.ge.s32.totalorder %s31_s15, 2  ;;  %p50_p1 = scmp.ne.s32.totalorder %s1194_s29, %s1190_s28 }
   0x8   : > { %p51_p2 = scmp.eq.s32.totalorder %s1214_s12, 0  ;;  %p208_p5 = scmp.eq.s32.totalorder %s952_s13, 3 }
   0x9   : > { %s1551_s15 = smov (%p32_p0, %s31_s15), 0  ;;  %s1553_s16 = smov (!%p32_p0, %s34_s16), %s1210_s11 }
   0xa   : > { %1534 = sst [smem:[#allocation7_spill]] %s1551_s15  ;;  %s39_s17 = ssub.s32 %s1206_s10, %s1551_s15 }
   0xb   : > { %p1318_p3 = por %p51_p2, %p50_p1  ;;  %p36_p4 = scmp.ge.s32.totalorder %s1553_s16, 2 }
   0xc   : > { %p213_p6 = scmp.ne.s32.totalorder %s1190_s28, %s1186_s27  ;;  %p214_p7 = scmp.eq.s32.totalorder %s953_s14, 3 }
   0xd   : > { %s1555_s16 = smov (%p36_p4, %s1553_s16), 0  ;;  %p1326_p8 = por %p208_p5, %p50_p1 }
   0xe   : > { %1536 = sst [smem:[#allocation8_spill]] %s1555_s16  ;;  %p1330_p9 = por %p214_p7, %p213_p6 }
   0xf   : > { %s38_s21 = ssub.s32 %s1210_s11, %s1555_s16  ;;  %s43_s23 = sadd.s32 1, %s1194_s29 }
  0x10   : > { %s40_s22 = sor.u32 %s39_s17, %s38_s21  ;;  %p955_p11 = scmp.ge.s32.totalorder %s1214_s12, 4 }
  0x11   : > { %p41_p10 = scmp.eq.s32.totalorder %s40_s22, 0 }
  0x12   : > { %276 = sbr.rel (%p955_p11) target bundleno = 33 (0x21), region = 40 }
  0x13   : > { %s1338_s24 = scalar_select %p41_p10, %s1194_s29, %s43_s23  }
  0x19   : > { %279 = sbr.rel (!%p1318_p3) target bundleno = 33 (0x21), region = 44  ;;  %s281_s25 = sand.u32 (%p1318_p3), 1, %s1194_s29  }
  0x1a   : > { %s957_s26 = sshll.u32 (%p1318_p3), %s1210_s11, 3  ;;  %s956_s13 = sshll.u32 (%p1318_p3), %s281_s25, 4 }
  0x1b   : > { %s285_s14 = sadd.s32 (%p1318_p3), %s1206_s10, %s957_s26  ;;  %s283_s22 = scalar_lea.vmem (%p1318_p3), [#allocation2], %s956_s13 }
  0x1c   : > { %s958_s15 = sshll.u32 (%p1318_p3), %s285_s14, 2 }
  0x1d   : > { %s287_s21 = scalar_lea.vmem (%p1318_p3), %s1522_s0, %s958_s15 }
  0x1e   : > { %v303_v0 = vld [vmem:[%s287_s21] sm:$0xf] (%p1318_p3)  ;;  %v305_v1 = vld [vmem:[%s287_s21 + $0x8] sm:$0xf] (%p1318_p3)  ;;  %v307_v2 = vld [vmem:[%s287_s21 + $0x10] sm:$0xf] (%p1318_p3) }
  0x1f   : > { %304 = vst [vmem:[%s283_s22] sm:$0xf] (%p1318_p3), %v303_v0  ;;  %306 = vst [vmem:[%s283_s22 + $0x4] sm:$0xf] (%p1318_p3), %v305_v1  ;;  %v309_v3 = vld [vmem:[%s287_s21 + $0x18] sm:$0xf] (%p1318_p3) }
  0x20   : > { %308 = vst [vmem:[%s283_s22 + $0x8] sm:$0xf] %v307_v2  ;;  %310 = vst [vmem:[%s283_s22 + $0xc] sm:$0xf] %v309_v3 }
  0x21 PF: > { %p959_p12 = scmp.ge.s32.totalorder %s1214_s12, 1  ;;  %p340_p13 = scmp.lt.s32.totalorder %s1214_s12, 5 }
  0x23   : > { %p341_p0 = pnand %p959_p12, %p340_p13 }
  0x24   : > { %s1352_s16 = sand.u32 (!%p341_p0), 1, %s1190_s28   ;;  %v1110_v4 = vld [vmem:[%s1523_s1] sm:$0xff] (!%p341_p0)   ;;  %vm439_vm0 = vcmask (!%p341_p0), 261120   ;;  %v395_v6 = vld [vmem:[%s1524_s2 + $0x10] sm:$0xff] (!%p341_p0)  ;;  %v1216_v9 = vmov (!%p341_p0), 0   ;;  %v394_v10 = vld [vmem:[%s1524_s2 + $0x8] sm:$0xff] (!%p341_p0) }
  0x25   : > { %344 = sbr.rel (%p341_p0) target bundleno = 754 (0x2f2), region = 85  ;;  %s960_s23 = sshll.u32 (!%p341_p0), %s1352_s16, 4  ;;  %1007 = vmatprep.mubr.msk.bf16.mxu1 (!%p341_p0), %vm439_vm0, %v1110_v4  ;;  %v393_v5 = vld [vmem:[%s1524_s2] sm:$0xff] (!%p341_p0)  ;;  %1106 = vset.pattern.permute.xlu0 (!%p341_p0), %v1216_v9  ;;  %v396_v11 = vld [vmem:[%s1524_s2 + $0x18] sm:$0xff] (!%p341_p0)  ;;  %v1111_v13 = vld [vmem:[%s1523_s1 + $0x8] sm:$0xff] (!%p341_p0)  }
  0x26   : > { %s349_s17 = scalar_lea.vmem (!%p341_p0), [#allocation2], %s960_s23  ;;  %1107 = vset.pattern.permute.xlu1 (!%p341_p0), %v1216_v9  ;;  %399 = vperm.xlu0 (!%p341_p0), %1106, %v393_v5   ;;  %v505_v12 = vld [vmem:[%s1526_s4] sm:$0xff] (!%p341_p0)  ;;  %v506_v14 = vld [vmem:[%s1526_s4 + $0x8] sm:$0xff] (!%p341_p0)  ;;  %v507_v15 = vld [vmem:[%s1526_s4 + $0x10] sm:$0xff] (!%p341_p0)  ;;  %s983_s15 = sshll.u32 (!%p341_p0), %s1202_s9, 3 }
  0x27   : > { %v1365_v7 = vld [vmem:[%s349_s17] sm:$0xff] (!%p341_p0)   ;;  %v1367_v8 = vld [vmem:[%s349_s17 + $0x8] sm:$0xff] (!%p341_p0)   ;;  %409 = vperm.xlu1 (!%p341_p0), %1107, %v395_v6   ;;  %s1533_s18 = sshll.u32 (!%p341_p0), %s1352_s16, 5  ;;  %s1447_s23 = sadd.s32 (!%p341_p0), %s1198_s30, %s983_s15 }
  0x28   : > { %1003 = vmatprep.subr.bf16.mxu1 (!%p341_p0), %v1365_v7  ;;  %v508_v16 = vld [vmem:[%s1526_s4 + $0x18] sm:$0xff] (!%p341_p0)  ;;  %v608_v17 = vld [vmem:[%s1528_s6] sm:$0xff] (!%p341_p0)  ;;  %v609_v18 = vld [vmem:[%s1528_s6 + $0x8] sm:$0xff] (!%p341_p0)  ;;  %v755_v9 = vunpack.c.l.bf16 (!%p341_p0), %v1367_v8  ;;  %s377_s25 = scalar_lea.vmem (!%p341_p0), [#allocation3], %s1533_s18  ;;  %s984_s9 = sshll.u32 (!%p341_p0), %s1447_s23, 7 }
  0x29   : > { %1004 = vmatpush3.bf16.msra.mxu1 (!%p341_p0), %v1365_v7  ;;  %v610_v19 = vld [vmem:[%s1528_s6 + $0x10] sm:$0xff] (!%p341_p0)  ;;  %v611_v20 = vld [vmem:[%s1528_s6 + $0x18] sm:$0xff] (!%p341_p0)  ;;  %v612_v21 = vld [vmem:[%s1528_s6 + $0x20] sm:$0xff] (!%p341_p0)  ;;  %s788_s26 = sshll.u32 (!%p341_p0), %s377_s25, 4  ;;  %s1460_s14 = scalar_lea.hbm (!%p341_p0), %s1529_s7, %s984_s9  ;;  %s1455_s26 = int_to_ptr.vmem [resolvable:$true] %s788_s26 }
  0x2a   : > { %1005 = vmatprep.subr.bf16.mxu1 (!%p341_p0), %v1367_v8  ;;  %404 = vperm.xlu0 (!%p341_p0), %1106, %v394_v10   ;;  %v613_v22 = vld [vmem:[%s1528_s6 + $0x28] sm:$0xff] (!%p341_p0)  ;;  %v614_v23 = vld [vmem:[%s1528_s6 + $0x30] sm:$0xff] (!%p341_p0)  ;;  %v615_v24 = vld [vmem:[%s1528_s6 + $0x38] sm:$0xff] (!%p341_p0)  ;;  %v753_v10 = vunpack.c.l.bf16 (!%p341_p0), %v1365_v7  ;;  %s1120_s21 = scalar_lea.vmem (!%p341_p0), %s1455_s26, 512  ;;  %s1217_s22 = smov (!%p341_p0), [#allocation3]  }
  0x2b   : > { %414 = vperm.xlu1 (!%p341_p0), %1107, %v396_v11   ;;  %v1112_v25 = vld [vmem:[%s1525_s3] sm:$0xff] (!%p341_p0)   ;;  %v1113_v44 = vld [vmem:[%s1525_s3 + $0x8] sm:$0xff] (!%p341_p0)   ;;  %v1116_v1 = vld [vmem:[%s1527_s5 + $0x10] sm:$0xff] (!%p341_p0)   ;;  %p1121_p1 = scmp.ne.s32.totalorder (!%p341_p0), %s1455_s26, %s1120_s21  ;;  %s1124_s15 = sshll.u32 (!%p341_p0), %s1217_s22, 4  ;;  %s1125_s15 = int_to_ptr.vmem [resolvable:$false] %s1124_s15 }
  0x2c   : > { %v1114_v45 = vld [vmem:[%s1527_s5] sm:$0xff]   ;;  %v1115_v0 = vld [vmem:[%s1527_s5 + $0x8] sm:$0xff]   ;;  %v1117_v2 = vld [vmem:[%s1527_s5 + $0x18] sm:$0xff]   ;;  %s1126_s9 = scalar_lea.vmem %s1125_s15, 1024  ;;  %p1127_p4 = scmp.lt.s32.totalorder %s1455_s26, %s1125_s15 }
  0x2d   : > { %1006 = vmatpush3.bf16.msra.mxu1 %v1367_v8  ;;  %1023 = vmatprep.mubr.msk.bf16.mxu0 %vm439_vm0, %v1114_v45  ;;  %p1122_p2 = pnand %p1121_p1, %p1326_p8  ;;  %p1128_p5 = scmp.lt.s32.totalorder %s1126_s9, %s1120_s21 }
  0x2e   : > { %511 = vperm.xlu0 %1106, %v505_v12  }
  0x2f   : > { %516 = vperm.xlu1 %1107, %v506_v14   ;;  %v756_v14 = vunpack.c.h.bf16 %v1367_v8  ;;  %p1123_p3 = pneg %p1122_p2  ;;  %p1129_p6 = por %p1128_p5, %p1127_p4 }
  0x30   : > { %1008 = vmatmul.mubr.msk.bf16.vlgmr.msra.gmra.mrb[0].mxu1 %vm439_vm0, %v1111_v13 }
  0x31   : > { %1015 = vmatprep.mubr.msk.bf16.mxu1 %vm439_vm0, %v1112_v25  ;;  %p1130_p7 = pnand %p1129_p6, %p1123_p3 }
  0x32   : > { %521 = vperm.xlu0 %1106, %v507_v15   ;;  %v754_v15 = vunpack.c.h.bf16 %v1365_v7 }
  0x33   : > { %526 = vperm.xlu1 %1107, %v508_v16  }
  0x36   : > { %618 = vperm.xlu0 %1106, %v608_v17  }
  0x37   : > { %623 = vperm.xlu1 %1107, %v609_v18  }
  0x3a   : > { %628 = vperm.xlu0 %1106, %v610_v19  }
  0x3b   : > { %633 = vperm.xlu1 %1107, %v611_v20  }
  0x3e   : > { %638 = vperm.xlu0 %1106, %v612_v21  }
  0x3f   : > { %643 = vperm.xlu1 %1107, %v613_v22  }
  0x42   : > { %648 = vperm.xlu0 %1106, %v614_v23  }
  0x43   : > { %653 = vperm.xlu1 %1107, %v615_v24  }
  0xa5   : > { %v400_v27 = vpop.permute.xlu0 %399 }
  0xa6   : > { %v410_v26 = vpop.permute.xlu1 %409 }
  0xa9   : > { %v405_v34 = vpop.permute.xlu0 %404 }
  0xaa   : > { %v415_v31 = vpop.permute.xlu1 %414 }
  0xad   : > { %v512_v46 = vpop.permute.xlu0 %511 }
  0xae   : > { %v517_v47 = vpop.permute.xlu1 %516 }
  0xb1   : > { %v522_v48 = vpop.permute.xlu0 %521 }
  0xb2   : > { %v527_v52 = vpop.permute.xlu1 %526 }
  0xb5   : > { %v619_v3 = vpop.permute.xlu0 %618 }
  0xb6   : > { %v624_v4 = vpop.permute.xlu1 %623 }
  0xb9   : > { %v629_v5 = vpop.permute.xlu0 %628 }
  0xba   : > { %v634_v6 = vpop.permute.xlu1 %633 }
  0xbd   : > { %v639_v16 = vpop.permute.xlu0 %638 }
  0xbe   : > { %v644_v22 = vpop.permute.xlu1 %643 }
  0xc1   : > { %v649_v25 = vpop.permute.xlu0 %648 }
 0x103   : > { %v1009_v28 = vpop.f32.mrb[0].mxu1 }
 0x104   : > { %v489_v29 = vadd.f32 %v1009_v28, %v410_v26  ;;  %v480_v30 = vpop.f32.mrb[1].mxu1 }
 0x105   : > { %v481_v32 = vadd.f32 %v480_v30, %v400_v27  ;;  %v1010_v33 = vpop.f32.mrb[2].mxu1 }
 0x106   : > { %v492_v35 = vadd.f32 %v1010_v33, %v415_v31  ;;  %v483_v36 = vpop.f32.mrb[3].mxu1  ;;  %v497_v38 = vmax.f32 %v489_v29, 0.0 }
 0x107   : > { %v484_v37 = vadd.f32 %v483_v36, %v405_v34  ;;  %v495_v40 = vmax.f32 %v481_v32, 0.0 }
 0x108   : > { %v498_v39 = vmax.f32 %v492_v35, 0.0 }
 0x109   : > { %v496_v41 = vmax.f32 %v484_v37, 0.0 }
 0x10a   : > { %v504_v42 = vpack.c.bf16 %v498_v39, %v497_v38 }
 0x10b   : > { %v503_v43 = vpack.c.bf16 %v496_v41, %v495_v40 }
 0x10d   : > { %1011 = vmatprep.subr.bf16.mxu1 %v503_v43 }
 0x10e   : > { %1012 = vmatpush3.bf16.msra.mxu1 %v503_v43 }
 0x10f   : > { %1013 = vmatprep.subr.bf16.mxu1 %v504_v42 }
 0x112   : > { %1014 = vmatpush3.bf16.msra.mxu1 %v504_v42 }
 0x115   : > { %1016 = vmatmul.mubr.msk.bf16.vlgmr.msra.gmra.mrb[4].mxu1 %vm439_vm0, %v1113_v44 }
 0x1e8   : > { %v1017_v49 = vpop.f32.mrb[4].mxu1 }
 0x1e9   : > { %v588_v50 = vadd.f32 %v1017_v49, %v522_v48  ;;  %v579_v51 = vpop.f32.mrb[5].mxu1 }
 0x1ea   : > { %v580_v53 = vadd.f32 %v579_v51, %v512_v46  ;;  %v1018_v54 = vpop.f32.mrb[6].mxu1 }
 0x1eb   : > { %v591_v55 = vadd.f32 %v1018_v54, %v527_v52  ;;  %v582_v56 = vpop.f32.mrb[7].mxu1  ;;  %v596_v58 = vmax.f32 %v588_v50, 0.0 }
 0x1ec   : > { %v583_v57 = vadd.f32 %v582_v56, %v517_v47  ;;  %v594_v60 = vmax.f32 %v580_v53, 0.0 }
 0x1ed   : > { %v597_v59 = vmax.f32 %v591_v55, 0.0 }
 0x1ee   : > { %v595_v61 = vmax.f32 %v583_v57, 0.0 }
 0x1ef   : > { %v607_v62 = vpack.c.bf16 %v597_v59, %v596_v58 }
 0x1f0   : > { %v606_v63 = vpack.c.bf16 %v595_v61, %v594_v60 }
 0x1f2   : > { %1019 = vmatprep.subr.bf16.mxu0 %v606_v63 }
 0x1f3   : > { %1020 = vmatpush3.bf16.msra.mxu0 %v606_v63 }
 0x1f4   : > { %1021 = vmatprep.subr.bf16.mxu0 %v607_v62 }
 0x1f7   : > { %1022 = vmatpush3.bf16.msra.mxu0 %v607_v62 }
 0x1fa   : > { %1024 = vmatmul.mubr.msk.bf16.vlgmr.msra.gmra.mrb[0].mxu0 %vm439_vm0, %v1115_v0 }
 0x1fb   : > { %1027 = vmatprep.mubr.msk.bf16.mxu0 %vm439_vm0, %v1116_v1 }
 0x202   : > { %1028 = vmatmul.mubr.msk.bf16.gmra.mrb[4].mxu0 %vm439_vm0, %v1117_v2 }
 0x2cd   : > { %v1025_v11 = vpop.f32.mrb[0].mxu0 }
 0x2ce   : > { %v731_v12 = vadd.f32 %v1025_v11, %v629_v5  ;;  %v722_v13 = vpop.f32.mrb[1].mxu0 }
 0x2cf   : > { %v723_v17 = vadd.f32 %v722_v13, %v619_v3  ;;  %v1026_v18 = vpop.f32.mrb[2].mxu0 }
 0x2d0   : > { %v759_v19 = vadd.f32 %v755_v9, %v731_v12  ;;  %v734_v20 = vadd.f32 %v1026_v18, %v634_v6  ;;  %v725_v21 = vpop.f32.mrb[3].mxu0 }
 0x2d1   : > { %v757_v23 = vadd.f32 %v753_v10, %v723_v17  ;;  %v726_v24 = vadd.f32 %v725_v21, %v624_v4 }
 0x2d2   : > { %763 = vst [vmem:[%s377_s25 + $0x10] sm:$0xff] %v759_v19  ;;  %v760_v8 = vadd.f32 %v756_v14, %v734_v20 }
 0x2d3   : > { %761 = vst [vmem:[%s377_s25] sm:$0xff] %v757_v23  ;;  %v758_v7 = vadd.f32 %v754_v15, %v726_v24 }
 0x2d4   : > { %764 = vst [vmem:[%s377_s25 + $0x18] sm:$0xff] %v760_v8 }
 0x2d5   : > { %762 = vst [vmem:[%s377_s25 + $0x8] sm:$0xff] %v758_v7  ;;  %v1029_v26 = vpop.f32.mrb[4].mxu0 }
 0x2d6   : > { %v747_v27 = vadd.f32 %v1029_v26, %v649_v25  ;;  %v738_v28 = vpop.f32.mrb[5].mxu0 }
 0x2d7   : > { %1133 = shalt.err (!%p1130_p7)
}
 0x2d8   : > { %s1134_s25 = scalar_lea.hbm %s1460_s14, 512  ;;  %s1138_s22 = scalar_lea.hbm %s1529_s7, 2048 }
 0x2d9   : > { %p1135_p10 = scmp.ne.s32.totalorder %s1460_s14, %s1134_s25  ;;  %p1139_p13 = scmp.lt.u32.totalorder %s1460_s14, %s1529_s7 }
 0x2da   : > { %p1140_p0 = scmp.lt.u32.totalorder %s1138_s22, %s1134_s25  ;;  %p1142_p2 = scmp.lt.u32.totalorder %s1134_s25, %s1460_s14 }
 0x2db   : > { %p1136_p11 = pnand %p1135_p10, %p1326_p8 }
 0x2dc   : > { %p1141_p1 = por %p1140_p0, %p1139_p13 }
 0x2dd   : > { %p1137_p12 = pneg %p1136_p11 }
 0x2de   : > { %p1143_p3 = por %p1142_p2, %p1141_p1 }
 0x2e0   : > { %p1144_p4 = pnand %p1143_p3, %p1137_p12 }
 0x2e2   : > { %1147 = shalt.err (!%p1144_p4)
}
 0x2e3   : > { %s1218_s21 = smov 128   ;;  %s1219_s9 = smov 256   ;;  %v654_v29 = vpop.permute.xlu1 %653  ;;  %v739_v30 = vadd.f32 %v738_v28, %v639_v16  ;;  %v1030_v31 = vpop.f32.mrb[6].mxu0 }
 0x2e4   : > { %s1220_s17 = smov 8   ;;  %s1539_s30 = scalar_lea.sflag [#allocation4], %s1352_s16  ;;  %v750_v32 = vadd.f32 %v1030_v31, %v654_v29  ;;  %v741_v33 = vpop.f32.mrb[7].mxu0 }
 0x2e5   : > { %1031 = dma.vmem_to_hbm [thread:$0]  (%p1326_p8), %s1455_s26, 512, %s1460_s14, %s1539_s30, %s1218_s21, %s1219_s9, %s1220_s17   ;;  %v742_v34 = vadd.f32 %v741_v33, %v644_v22 }
 0x2e6   : > { %s1540_s18 = sshll.u32 %s1352_s16, 5  ;;  %797 = sbr.rel (!%p1326_p8) target bundleno = 754 (0x2f2), region = 97 }
 0x2e7   : > { %s383_s13 = scalar_lea.vmem [#allocation5], %s1540_s18  ;;  %s986_s25 = sshll.u32 (%p1326_p8), %s1447_s23, 3 }
 0x2e8   : > { %767 = vst [vmem:[%s383_s13 + $0x10] sm:$0xff] %v747_v27  ;;  %765 = vst [vmem:[%s383_s13] sm:$0xff] %v739_v30  ;;  %s801_s16 = scalar_lea.vmem (%p1326_p8), %s1530_s8, %s986_s25 }
 0x2e9   : > { %768 = vst [vmem:[%s383_s13 + $0x18] sm:$0xff] %v750_v32  ;;  %766 = vst [vmem:[%s383_s13 + $0x8] sm:$0xff] %v742_v34 }
 0x2ef   : > { %v835_v35 = vld [vmem:[%s383_s13] sm:$0xff]  ;;  %v839_v37 = vld [vmem:[%s383_s13 + $0x10] sm:$0xff] }
 0x2f0   : > { %v837_v36 = vld [vmem:[%s383_s13 + $0x8] sm:$0xff]  ;;  %v841_v38 = vld [vmem:[%s383_s13 + $0x18] sm:$0xff]  ;;  %836 = vst [vmem:[%s801_s16] sm:$0xff] %v835_v35  ;;  %840 = vst [vmem:[%s801_s16 + $0x20] sm:$0xff] %v839_v37 }
 0x2f1   : > { %838 = vst [vmem:[%s801_s16 + $0x10] sm:$0xff] %v837_v36  ;;  %842 = vst [vmem:[%s801_s16 + $0x30] sm:$0xff] %v841_v38 }
 0x2f2 PF: > { %p1037_p8 = scmp.ge.s32.totalorder %s1214_s12, 2  ;;  %s854_s19 = sand.u32 1, %s1186_s27  }
 0x2f3   : > { %s855_s23 = scalar_lea.sflag [#allocation4], %s854_s19 }
 0x2f4   : > { %p1034_p5 = pnand %p1037_p8, %p1330_p9 }
 0x2f6   : > { %1181 = dma.done.wait (!%p1034_p5), %s855_s23, 512  }
 0x2f7   : > { %1183 = vsyncadd (!%p1034_p5), %s855_s23, 4294966784  ;;  %s22_s12 = sadd.s32 1, %s1214_s12   ;;  %s1541_s17 = sld [smem:[#allocation7_spill]] }
 0x2f8   : > { %p19_p6 = scmp.ge.s32.totalorder %s22_s12, 6   ;;  %s1542_s22 = sld [smem:[#allocation8_spill]] }
 0x2f9   : > { %s1543_s27 = smov %s1190_s28  ;;  %s1544_s28 = smov %s1194_s29 }
 0x2fa   : > { %s1545_s29 = smov %s1338_s24  ;;  %s1546_s30 = smov %s1206_s10 }
 0x2fb   : > { %s1547_s9 = smov %s1210_s11  ;;  %21 = sbr.rel (!%p19_p6) target bundleno = 5 (0x5), region = 179 }
 0x2fd   : > { %s1548_s10 = smov %s1541_s17 }
 0x2fe   : > { %s1549_s11 = smov %s1542_s22 }
 0x302   :  { %867 = vsyncpa [#allocation4], 1 }
 0x303   :  { %869 = vsyncpa [#allocation4 + $0x1], 1 }

</bundles_post_ra>
